<compile_context>
chip_gen: v5e
topology: v5e:2x2
jax: 0.10.0
libtpu: 0.0.40
codegen_flags: <defaults>
</compile_context>

<pallas_src>
import jax
import jax.numpy as jnp
from jax.experimental import pallas as pl
from jax.experimental.pallas import tpu as pltpu


def dictloss_kernel(xt_ref, d2t_ref, meany_ref, pscat_ref, vecs_ref,
                    at_ref, tarr_ref, lam2_ref, out_ref):
    npat = xt_ref.shape[0]
    m = d2t_ref.shape[1]

    # ss_b^T = x^T @ d^T + meanY  -> (npat, m); row k is patch column k.
    ss_bt = jnp.dot(xt_ref[...], d2t_ref[...],
                    preferred_element_type=jnp.float32) + meany_ref[...]

    # Scatter-add of every (pixel-in-patch, patch) contribution into the global
    # pixel row (1, N).  pscat rows [k*m, (k+1)*m) are the one-hot rows of
    # patches[:, k]; indices are unique within a column, so this equals the
    # PyTorch gather-assign '+=' loop.
    pscat = pscat_ref[...].astype(jnp.float32)          # bf16 storage -> f32 (exact for 0/1)
    acc = jnp.zeros((1, pscat.shape[1]), jnp.float32)
    for k in range(npat):                               # static unroll; npat is small
        acc = acc + jnp.dot(ss_bt[k:k + 1, :],
                            pscat[k * m:(k + 1) * m, :],
                            preferred_element_type=jnp.float32)

    lam2 = lam2_ref[0]                                  # SMEM scalar
    ds_row = vecs_ref[0:1, :]
    npp_row = vecs_ref[1:2, :]
    vb_row = vecs_ref[2:3, :]
    sref_row = vecs_ref[3:4, :]

    inv = pl.reciprocal(lam2 + npp_row, approx=False)   # exact; tolerance-safe
    ss_row = (lam2 * ds_row + acc) * inv * vb_row       # (1, N)

    # Tref^T = (ss + sRef)^T @ A^T -> lane-dense (1, M)
    tref_row = jnp.dot(ss_row + sref_row, at_ref[...],
                       preferred_element_type=jnp.float32)
    diff = tref_row - tarr_ref[...]
    out_ref[...] = (jnp.sum(diff * diff, axis=(0, 1), keepdims=True)
                    / jnp.float32(diff.shape[1]))


def build_patch_scatter(patches, n_pixels):
    """One-hot scatter matrix (npat*m, N) in bf16.

    Depends only on `patches`, which is fixed across training steps, so build
    it ONCE and reuse (hoisted out of the per-call wrapper per perf review).
    Row k*m + i is the one-hot of patches[i, k] (column-major flatten).
    """
    m, npat = patches.shape
    # Scatter-as-matmul equals the PyTorch gather-assign loop only if pixel
    # indices are unique within each patch column (standard patch extraction).
    srt = jnp.sort(patches, axis=0)
    assert bool(jnp.all(srt[1:, :] != srt[:-1, :])), \
        "patches[:, k] must contain unique pixel indices"
    flat_cm = jnp.transpose(patches).reshape(-1).astype(jnp.int32)   # idx k*m + i
    return jax.nn.one_hot(flat_cm, n_pixels, dtype=jnp.bfloat16)     # (npat*m, N)


def dictloss_pallas(d, x, ss, vb, npatches, pscat, npp, sRef, A, Tarr,
                    meanY, ds, lam2):
    del ss, npatches  # only shapes / counts implied elsewhere
    d2 = jnp.squeeze(d, axis=0).astype(jnp.float32)      # (m, natoms)
    m, natoms = d2.shape
    npat = x.shape[1]
    N = npp.shape[0]
    M = A.shape[0]

    # Wrapper-side layout plumbing only (small transposes / one concat).
    xt = jnp.transpose(x.astype(jnp.float32))                        # (npat, natoms)
    d2t = jnp.transpose(d2)                                          # (natoms, m)
    meany_col = meanY.astype(jnp.float32).reshape(npat, 1)           # (npat, 1)
    vecs = jnp.concatenate(
        [ds.astype(jnp.float32).reshape(1, N),
         npp.astype(jnp.float32).reshape(1, N),
         vb.astype(jnp.float32).reshape(1, N),
         sRef.astype(jnp.float32).reshape(1, N)], axis=0)            # (4, N)
    a_t = jnp.transpose(A.astype(jnp.float32))                       # (N, M)
    tarr_row = Tarr.astype(jnp.float32).reshape(1, M)                # (1, M)
    lam2_arr = jnp.asarray(lam2, jnp.float32).reshape(1,)            # SMEM scalar

    vmem = pl.BlockSpec(memory_space=pltpu.MemorySpace.VMEM)
    smem = pl.BlockSpec(memory_space=pltpu.MemorySpace.SMEM)

    # Explicit VMEM budget sized to the real working set (with headroom).
    work_bytes = 4 * (xt.size + d2t.size + meany_col.size + vecs.size
                      + a_t.size + tarr_row.size) + 2 * pscat.size
    vmem_limit = int(max(4 * 1024 * 1024, 8 * work_bytes))

    out = pl.pallas_call(
        dictloss_kernel,
        out_shape=jax.ShapeDtypeStruct((1, 1), jnp.float32),
        in_specs=[vmem] * 7 + [smem],
        out_specs=vmem,
        compiler_params=pltpu.CompilerParams(vmem_limit_bytes=vmem_limit),
    )(xt, d2t, meany_col, pscat, vecs, a_t, tarr_row, lam2_arr)
    return out[0, 0]


def dictloss_reference(d, x, ss, vb, patches, npp, sRef, A, Tarr, meanY, ds, lam2):
    # Pure-JAX reference mirroring the PyTorch forward (unique indices per column).
    d2 = jnp.squeeze(d)
    ss_b = d2 @ x + meanY                                    # (m, npatches)
    N = ss.shape[0]
    ss_p_sum = jnp.zeros((N, 1), jnp.float32)
    ss_p_sum = ss_p_sum.at[patches.reshape(-1), 0].add(ss_b.reshape(-1))
    ss_f = (lam2 * ds + ss_p_sum) / (lam2 + npp)
    ss_v = ss_f * vb
    tref = A @ (ss_v + sRef)
    return jnp.mean((tref - Tarr) ** 2)


if __name__ == "__main__":
    # Small synthetic shapes consistent with the forward pass.
    m = 16          # pixels per patch
    natoms = 32     # dictionary atoms
    npatches = 8    # number of patches
    N = 64          # total number of pixels
    M = 16          # number of measurements

    key = jax.random.PRNGKey(0)
    k_d, k_x, k_mean, k_ds, k_vb, k_sref, k_A, k_T, key = jax.random.split(key, 9)

    d = jax.random.normal(k_d, (1, m, natoms), jnp.float32)        # squeezed inside
    x = jax.random.normal(k_x, (natoms, npatches), jnp.float32)
    meanY = jax.random.normal(k_mean, (1, npatches), jnp.float32)
    ds = jax.random.normal(k_ds, (N, 1), jnp.float32)
    vb = (jax.random.uniform(k_vb, (N, 1)) > 0.2).astype(jnp.float32)
    sRef = jax.random.normal(k_sref, (N, 1), jnp.float32)
    A = jax.random.normal(k_A, (M, N), jnp.float32) / jnp.sqrt(N)
    Tarr = jax.random.normal(k_T, (M, 1), jnp.float32)
    lam2 = jnp.float32(0.1)

    # Patch index table: each column holds unique pixel indices.
    cols = []
    for k in range(npatches):
        key, sub = jax.random.split(key)
        cols.append(jax.random.permutation(sub, N)[:m])
    patches = jnp.stack(cols, axis=1).astype(jnp.int32)            # (m, npatches)

    # npp: number of patches covering each pixel.
    npp = jnp.zeros((N,), jnp.float32).at[patches.reshape(-1)].add(1.0).reshape(N, 1)

    ss = jnp.zeros((N, 1), jnp.float32)                            # only its shape is used

    # Hoisted, patches-only constant (built once, reused across steps).
    pscat = build_patch_scatter(patches, N)

    dictloss_fn = jax.jit(dictloss_pallas)
    loss = dictloss_fn(d, x, ss, vb, npatches, pscat, npp, sRef, A, Tarr,
                       meanY, ds, lam2)
    loss = jax.block_until_ready(loss)

    ref = dictloss_reference(d, x, ss, vb, patches, npp, sRef, A, Tarr,
                             meanY, ds, lam2)
    assert jnp.allclose(loss, ref, rtol=1e-4, atol=1e-4), (loss, ref)
    print("KERNEL_OK")
</pallas_src>

<mosaic_0001>
module attributes {stable_mosaic.version = 11 : i64} {
  func.func @dictloss_kernel(%arg0: memref<8x32xf32, #tpu.memory_space<vmem>>, %arg1: memref<32x16xf32, #tpu.memory_space<vmem>>, %arg2: memref<8x1xf32, #tpu.memory_space<vmem>>, %arg3: memref<128x64xbf16, #tpu.memory_space<vmem>>, %arg4: memref<4x64xf32, #tpu.memory_space<vmem>>, %arg5: memref<64x16xf32, #tpu.memory_space<vmem>>, %arg6: memref<1x16xf32, #tpu.memory_space<vmem>>, %arg7: memref<1xf32, #tpu.memory_space<smem>>, %arg8: memref<1x1xf32, #tpu.memory_space<vmem>>) attributes {dimension_semantics = [], scalar_prefetch = 0 : i64, scratch_operands = 0 : i64, tpu.core_type = #tpu.core_type<tc>} {
    %c0 = arith.constant 0 : index
    %c0_0 = arith.constant 0 : index
    %0 = vector.load %arg0[%c0, %c0_0] : memref<8x32xf32, #tpu.memory_space<vmem>>, vector<8x32xf32>
    %c0_1 = arith.constant 0 : index
    %c0_2 = arith.constant 0 : index
    %1 = vector.load %arg1[%c0_1, %c0_2] : memref<32x16xf32, #tpu.memory_space<vmem>>, vector<32x16xf32>
    %cst = arith.constant dense<0.000000e+00> : vector<8x16xf32>
    %2 = tpu.matmul %0, %1, %cst {dimension_numbers = #tpu.dot_dimension_numbers<[1], [0], [0], [1], [0, 0, 1, 1], [], []>} : vector<8x32xf32>, vector<32x16xf32>, vector<8x16xf32> -> vector<8x16xf32>
    %c0_3 = arith.constant 0 : index
    %c0_4 = arith.constant 0 : index
    %3 = vector.load %arg2[%c0_3, %c0_4] : memref<8x1xf32, #tpu.memory_space<vmem>>, vector<8x1xf32>
    %4 = vector.broadcast %3 : vector<8x1xf32> to vector<8x16xf32>
    %5 = arith.addf %2, %4 : vector<8x16xf32>
    %c0_5 = arith.constant 0 : index
    %c0_6 = arith.constant 0 : index
    %6 = vector.load %arg3[%c0_5, %c0_6] : memref<128x64xbf16, #tpu.memory_space<vmem>>, vector<128x64xbf16>
    %7 = arith.extf %6 : vector<128x64xbf16> to vector<128x64xf32>
    %cst_7 = arith.constant 0.000000e+00 : f32
    %8 = vector.broadcast %cst_7 : f32 to vector<1x64xf32>
    %9 = vector.extract_strided_slice %5 {offsets = [0, 0], sizes = [1, 16], strides = [1, 1]} : vector<8x16xf32> to vector<1x16xf32>
    %10 = vector.extract_strided_slice %7 {offsets = [0, 0], sizes = [16, 64], strides = [1, 1]} : vector<128x64xf32> to vector<16x64xf32>
    %cst_8 = arith.constant dense<0.000000e+00> : vector<1x64xf32>
    %11 = tpu.matmul %9, %10, %cst_8 {dimension_numbers = #tpu.dot_dimension_numbers<[1], [0], [0], [1], [0, 0, 1, 1], [], []>} : vector<1x16xf32>, vector<16x64xf32>, vector<1x64xf32> -> vector<1x64xf32>
    %12 = arith.addf %8, %11 : vector<1x64xf32>
    %13 = vector.extract_strided_slice %5 {offsets = [1, 0], sizes = [1, 16], strides = [1, 1]} : vector<8x16xf32> to vector<1x16xf32>
    %14 = vector.extract_strided_slice %7 {offsets = [16, 0], sizes = [16, 64], strides = [1, 1]} : vector<128x64xf32> to vector<16x64xf32>
    %cst_9 = arith.constant dense<0.000000e+00> : vector<1x64xf32>
    %15 = tpu.matmul %13, %14, %cst_9 {dimension_numbers = #tpu.dot_dimension_numbers<[1], [0], [0], [1], [0, 0, 1, 1], [], []>} : vector<1x16xf32>, vector<16x64xf32>, vector<1x64xf32> -> vector<1x64xf32>
    %16 = arith.addf %12, %15 : vector<1x64xf32>
    %17 = vector.extract_strided_slice %5 {offsets = [2, 0], sizes = [1, 16], strides = [1, 1]} : vector<8x16xf32> to vector<1x16xf32>
    %18 = vector.extract_strided_slice %7 {offsets = [32, 0], sizes = [16, 64], strides = [1, 1]} : vector<128x64xf32> to vector<16x64xf32>
    %cst_10 = arith.constant dense<0.000000e+00> : vector<1x64xf32>
    %19 = tpu.matmul %17, %18, %cst_10 {dimension_numbers = #tpu.dot_dimension_numbers<[1], [0], [0], [1], [0, 0, 1, 1], [], []>} : vector<1x16xf32>, vector<16x64xf32>, vector<1x64xf32> -> vector<1x64xf32>
    %20 = arith.addf %16, %19 : vector<1x64xf32>
    %21 = vector.extract_strided_slice %5 {offsets = [3, 0], sizes = [1, 16], strides = [1, 1]} : vector<8x16xf32> to vector<1x16xf32>
    %22 = vector.extract_strided_slice %7 {offsets = [48, 0], sizes = [16, 64], strides = [1, 1]} : vector<128x64xf32> to vector<16x64xf32>
    %cst_11 = arith.constant dense<0.000000e+00> : vector<1x64xf32>
    %23 = tpu.matmul %21, %22, %cst_11 {dimension_numbers = #tpu.dot_dimension_numbers<[1], [0], [0], [1], [0, 0, 1, 1], [], []>} : vector<1x16xf32>, vector<16x64xf32>, vector<1x64xf32> -> vector<1x64xf32>
    %24 = arith.addf %20, %23 : vector<1x64xf32>
    %25 = vector.extract_strided_slice %5 {offsets = [4, 0], sizes = [1, 16], strides = [1, 1]} : vector<8x16xf32> to vector<1x16xf32>
    %26 = vector.extract_strided_slice %7 {offsets = [64, 0], sizes = [16, 64], strides = [1, 1]} : vector<128x64xf32> to vector<16x64xf32>
    %cst_12 = arith.constant dense<0.000000e+00> : vector<1x64xf32>
    %27 = tpu.matmul %25, %26, %cst_12 {dimension_numbers = #tpu.dot_dimension_numbers<[1], [0], [0], [1], [0, 0, 1, 1], [], []>} : vector<1x16xf32>, vector<16x64xf32>, vector<1x64xf32> -> vector<1x64xf32>
    %28 = arith.addf %24, %27 : vector<1x64xf32>
    %29 = vector.extract_strided_slice %5 {offsets = [5, 0], sizes = [1, 16], strides = [1, 1]} : vector<8x16xf32> to vector<1x16xf32>
    %30 = vector.extract_strided_slice %7 {offsets = [80, 0], sizes = [16, 64], strides = [1, 1]} : vector<128x64xf32> to vector<16x64xf32>
    %cst_13 = arith.constant dense<0.000000e+00> : vector<1x64xf32>
    %31 = tpu.matmul %29, %30, %cst_13 {dimension_numbers = #tpu.dot_dimension_numbers<[1], [0], [0], [1], [0, 0, 1, 1], [], []>} : vector<1x16xf32>, vector<16x64xf32>, vector<1x64xf32> -> vector<1x64xf32>
    %32 = arith.addf %28, %31 : vector<1x64xf32>
    %33 = vector.extract_strided_slice %5 {offsets = [6, 0], sizes = [1, 16], strides = [1, 1]} : vector<8x16xf32> to vector<1x16xf32>
    %34 = vector.extract_strided_slice %7 {offsets = [96, 0], sizes = [16, 64], strides = [1, 1]} : vector<128x64xf32> to vector<16x64xf32>
    %cst_14 = arith.constant dense<0.000000e+00> : vector<1x64xf32>
    %35 = tpu.matmul %33, %34, %cst_14 {dimension_numbers = #tpu.dot_dimension_numbers<[1], [0], [0], [1], [0, 0, 1, 1], [], []>} : vector<1x16xf32>, vector<16x64xf32>, vector<1x64xf32> -> vector<1x64xf32>
    %36 = arith.addf %32, %35 : vector<1x64xf32>
    %37 = vector.extract_strided_slice %5 {offsets = [7, 0], sizes = [1, 16], strides = [1, 1]} : vector<8x16xf32> to vector<1x16xf32>
    %38 = vector.extract_strided_slice %7 {offsets = [112, 0], sizes = [16, 64], strides = [1, 1]} : vector<128x64xf32> to vector<16x64xf32>
    %cst_15 = arith.constant dense<0.000000e+00> : vector<1x64xf32>
    %39 = tpu.matmul %37, %38, %cst_15 {dimension_numbers = #tpu.dot_dimension_numbers<[1], [0], [0], [1], [0, 0, 1, 1], [], []>} : vector<1x16xf32>, vector<16x64xf32>, vector<1x64xf32> -> vector<1x64xf32>
    %40 = arith.addf %36, %39 : vector<1x64xf32>
    %c0_16 = arith.constant 0 : index
    %41 = memref.load %arg7[%c0_16] : memref<1xf32, #tpu.memory_space<smem>>
    %c0_17 = arith.constant 0 : index
    %c0_18 = arith.constant 0 : index
    %42 = vector.load %arg4[%c0_17, %c0_18] : memref<4x64xf32, #tpu.memory_space<vmem>>, vector<1x64xf32>
    %c1 = arith.constant 1 : index
    %c0_19 = arith.constant 0 : index
    %43 = vector.load %arg4[%c1, %c0_19] : memref<4x64xf32, #tpu.memory_space<vmem>>, vector<1x64xf32>
    %c2 = arith.constant 2 : index
    %c0_20 = arith.constant 0 : index
    %44 = vector.load %arg4[%c2, %c0_20] : memref<4x64xf32, #tpu.memory_space<vmem>>, vector<1x64xf32>
    %c3 = arith.constant 3 : index
    %c0_21 = arith.constant 0 : index
    %45 = vector.load %arg4[%c3, %c0_21] : memref<4x64xf32, #tpu.memory_space<vmem>>, vector<1x64xf32>
    %46 = vector.broadcast %41 : f32 to vector<1x64xf32>
    %47 = arith.addf %46, %43 : vector<1x64xf32>
    %48 = tpu.reciprocal %47 : vector<1x64xf32> -> vector<1x64xf32>
    %49 = vector.broadcast %41 : f32 to vector<1x64xf32>
    %50 = arith.mulf %49, %42 : vector<1x64xf32>
    %51 = arith.addf %50, %40 : vector<1x64xf32>
    %52 = arith.mulf %51, %48 : vector<1x64xf32>
    %53 = arith.mulf %52, %44 : vector<1x64xf32>
    %54 = arith.addf %53, %45 : vector<1x64xf32>
    %c0_22 = arith.constant 0 : index
    %c0_23 = arith.constant 0 : index
    %55 = vector.load %arg5[%c0_22, %c0_23] : memref<64x16xf32, #tpu.memory_space<vmem>>, vector<64x16xf32>
    %cst_24 = arith.constant dense<0.000000e+00> : vector<1x16xf32>
    %56 = tpu.matmul %54, %55, %cst_24 {dimension_numbers = #tpu.dot_dimension_numbers<[1], [0], [0], [1], [0, 0, 1, 1], [], []>} : vector<1x64xf32>, vector<64x16xf32>, vector<1x16xf32> -> vector<1x16xf32>
    %c0_25 = arith.constant 0 : index
    %c0_26 = arith.constant 0 : index
    %57 = vector.load %arg6[%c0_25, %c0_26] : memref<1x16xf32, #tpu.memory_space<vmem>>, vector<1x16xf32>
    %58 = arith.subf %56, %57 : vector<1x16xf32>
    %59 = arith.mulf %58, %58 : vector<1x16xf32>
    %60 = vector.shape_cast %59 : vector<1x16xf32> to vector<1x1x16xf32>
    %cst_27 = arith.constant dense<0.000000e+00> : vector<1xf32>
    %61 = vector.multi_reduction <add>, %60, %cst_27 [1, 2] : vector<1x1x16xf32> to vector<1xf32>
    %62 = vector.shape_cast %61 : vector<1xf32> to vector<1x1x1xf32>
    %63 = vector.extract %62[0, 0, 0] : f32 from vector<1x1x1xf32>
    %64 = vector.broadcast %63 : f32 to vector<1x1xf32>
    %cst_28 = arith.constant 1.600000e+01 : f32
    %65 = vector.broadcast %cst_28 : f32 to vector<1x1xf32>
    %66 = arith.divf %64, %65 : vector<1x1xf32>
    %c0_29 = arith.constant 0 : index
    %c0_30 = arith.constant 0 : index
    %67 = vector.load %arg8[%c0_29, %c0_30] : memref<1x1xf32, #tpu.memory_space<vmem>>, vector<1x1xf32>
    tpu.vector_store %arg8[%c0_29, %c0_30], %66 {strides = array<i32>} : memref<1x1xf32, #tpu.memory_space<vmem>>, vector<1x1xf32>,
    return
  }
}

</mosaic_0001>

<bundles_post_ra>
// kernel: dictloss_pallas.1
= control target key start
LH: loop header
LB: loop body
LE: loop exit
PB: predicated region body
PF: predicated region fallthrough
CT: control target
= control target key end

     0   :  { %v473_v2 = vmov 0   ;;  %s616_s0 = inlined_call_operand.vmem [shape: f32[8,32], index: 0, kind: input, shape index: {}]   ;;  %s617_s1 = inlined_call_operand.vmem [shape: f32[32,16], index: 1, kind: input, shape index: {}]   ;;  %s618_s2 = inlined_call_operand.vmem [shape: f32[8,1], index: 2, kind: input, shape index: {}]   ;;  %s619_s3 = inlined_call_operand.vmem [shape: bf16[128,64], index: 3, kind: input, shape index: {}]   ;;  %s620_s4 = inlined_call_operand.vmem [shape: f32[4,64], index: 4, kind: input, shape index: {}]   ;;  %s621_s5 = inlined_call_operand.vmem [shape: f32[64,16], index: 5, kind: input, shape index: {}]   ;;  %s622_s6 = inlined_call_operand.vmem [shape: f32[1,16], index: 6, kind: input, shape index: {}]   ;;  %s623_s7 = inlined_call_operand.<no memory space> [shape: f32[1], index: 7, kind: input, shape index: {}]   ;;  %s624_s8 = inlined_call_operand.hbm [shape: f32[1,1], index: 8, kind: output, shape index: {}]  }
   0x1   :  { %v35_v0 = vld [vmem:[%s617_s1 + $0x18] sm:$0xff]  ;;  %v34_v1 = vld [vmem:[%s617_s1 + $0x10] sm:$0xff]  ;;  %442 = vset.pattern.permute.xlu0 %v473_v2  ;;  %v36_v3 = vld [vmem:[%s618_s2] sm:$0xff] }
   0x2   :  { %58 = vmatpush.msra.mxu0 %v35_v0  ;;  %v33_v4 = vld [vmem:[%s617_s1 + $0x8] sm:$0xff]  ;;  %39 = vperm.xlu0 %442, %v36_v3   ;;  %v399_v5 = vld [vmem:[%s619_s3] sm:$0xff]  }
   0x3   :  { %14 = vsyncpa [#allocation4], 0  ;;  %v401_v6 = vunpack.c.h.bf16 %v399_v5  ;;  %v32_v7 = vld [vmem:[%s617_s1] sm:$0xff]  ;;  %vm42_vm0 = vcmask 261120   ;;  %v430_v9 = vld [vmem:[%s619_s3 + $0x8] sm:$0xff]   ;;  %v400_v13 = vunpack.c.l.bf16 %v399_v5  ;;  %vm100_vm1 = vcmask 130048  }
   0x4   :  { %59 = vmatpush.msra.mxu0 %v34_v1  ;;  %v31_v8 = vld [vmem:[%s616_s0] sm:$0xff]  ;;  %v435_v11 = vld [vmem:[%s619_s3 + $0x30] sm:$0xff]   ;;  %v405_v12 = vunpack.c.h.bf16 %v430_v9  ;;  %v404_v16 = vunpack.c.l.bf16 %v430_v9  ;;  %v432_v22 = vld [vmem:[%s619_s3 + $0x18] sm:$0xff]   ;;  %v294_v44 = vstv %s623_s7  ;;  %vm323_vm6 = vcmask 523264   ;;  %s379_s9 = sshll.u32 %s624_s8, 4  ;;  %s380_s9 = int_to_ptr.hbm [resolvable:$true] %s379_s9 }
   0x5   :  { %139 = vmatpush.msra.mxu3 %v401_v6  ;;  %v433_v10 = vld [vmem:[%s619_s3 + $0x20] sm:$0xff]   ;;  %v425_v15 = vunpack.c.h.bf16 %v435_v11  ;;  %v424_v18 = vunpack.c.l.bf16 %v435_v11  ;;  %v431_v19 = vld [vmem:[%s619_s3 + $0x10] sm:$0xff]   ;;  %v413_v23 = vunpack.c.h.bf16 %v432_v22  ;;  %v412_v24 = vunpack.c.l.bf16 %v432_v22  ;;  %v434_v25 = vld [vmem:[%s619_s3 + $0x28] sm:$0xff]  }
   0x6   :  { %60 = vmatpush.msra.mxu0 %v33_v4  ;;  %v417_v14 = vunpack.c.h.bf16 %v433_v10  ;;  %117 = vmatpush.msra.mxu1 %v405_v12  ;;  %v416_v17 = vunpack.c.l.bf16 %v433_v10  ;;  %v409_v20 = vunpack.c.h.bf16 %v431_v19  ;;  %v408_v21 = vunpack.c.l.bf16 %v431_v19  ;;  %v436_v29 = vld [vmem:[%s619_s3 + $0x38] sm:$0xff]   ;;  %v321_v42 = vld [vmem:[%s621_s5 + $0x30] sm:$0xff]  ;;  %v291_v43 = vld [vmem:[%s620_s4 + $0x1] sm:$0x1] }
   0x7   :  { %140 = vmatpush.msra.mxu3 %v400_v13  ;;  %v421_v28 = vunpack.c.h.bf16 %v434_v25  ;;  %v420_v31 = vunpack.c.l.bf16 %v434_v25  ;;  %v429_v35 = vunpack.c.h.bf16 %v436_v29  ;;  %v428_v36 = vunpack.c.l.bf16 %v436_v29  ;;  %v322_v41 = vld [vmem:[%s621_s5 + $0x38] sm:$0xff]  ;;  %v320_v45 = vld [vmem:[%s621_s5 + $0x28] sm:$0xff]  ;;  %v319_v47 = vld [vmem:[%s621_s5 + $0x20] sm:$0xff] }
   0x8   :  { %61 = vmatpush.msra.mxu0 %v32_v7  ;;  %210 = vmatpush.msra.mxu2 %v417_v14  ;;  %v295_v46 = vadd.f32 %v294_v44, %v291_v43  ;;  %v318_v48 = vld [vmem:[%s621_s5 + $0x18] sm:$0xff]  ;;  %v317_v49 = vld [vmem:[%s621_s5 + $0x10] sm:$0xff]  ;;  %v316_v50 = vld [vmem:[%s621_s5 + $0x8] sm:$0xff]  ;;  %vm350_vm7 = vcmask 122880   ;;  %vm370_vm9 = vcmask 0  }
   0x9   :  { %388 = vmatmul.msk.f32.vlgmr.msra.gmra.mxu0 %vm42_vm0, %v31_v8  ;;  %118 = vmatpush.msra.mxu1 %v404_v16  ;;  %v315_v51 = vld [vmem:[%s621_s5] sm:$0xff] }
   0xa   :  { %258 = vmatpush.msrb.mxu0 %v425_v15  ;;  %211 = vmatpush.msra.mxu2 %v416_v17  ;;  %443 = vrcp.f32 %v295_v46  ;;  %vm301_vm2 = vweird.f32 %v295_v46  ;;  %v307_v0 = vand.u32 2147483648, %v295_v46  ;;  %v305_v3 = vand.u32 2147483647, %v295_v46  ;;  %v290_v5 = vld [vmem:[%s620_s4] sm:$0x1] }
   0xb   :  { %162 = vmatpush.msrb.mxu3 %v409_v20  ;;  %186 = vmatpush.msrb.mxu1 %v413_v23  ;;  %v310_v11 = vmul.f32 %v294_v44, %v290_v5  ;;  %v292_v16 = vld [vmem:[%s620_s4 + $0x2] sm:$0x1] }
   0xc   :  { %259 = vmatpush.msrb.mxu0 %v424_v18  ;;  %335 = vmatpush.msrb.mxu2 %v322_v41  ;;  %v308_v8 = vor.u32 1.1754944e-38, %v307_v0  ;;  %vm306_vm5 = vcmp.eq.f32.partialorder %v305_v3, 8.507059e+37  ;;  %v293_v18 = vld [vmem:[%s620_s4 + $0x3] sm:$0x1]  ;;  %s475_s4 = smov [#allocation3]  }
   0xd   :  { %163 = vmatpush.msrb.mxu3 %v408_v21  ;;  %187 = vmatpush.msrb.mxu1 %v412_v24  ;;  %v347_v21 = vld [vmem:[%s622_s6] sm:$0x1]  ;;  %s377_s6 = sshll.u32 %s475_s4, 4  ;;  %s378_s6 = int_to_ptr.vmem [resolvable:$true] %s377_s6 }
   0xe   :  { %336 = vmatpush.msrb.mxu2 %v321_v42 }
  0x10   :  { %337 = vmatpush.msrb.mxu2 %v320_v45  ;;  %v444_v52 = vpop.eup %443 }
  0x11   :  { %v297_v55 = vmul.f32 %v444_v52, %v295_v46  ;;  %vm302_vm3 = vweird.f32 %v444_v52 }
  0x12   :  { %338 = vmatpush.msrb.mxu2 %v319_v47  ;;  %vm303_vm4 = vmor %vm301_vm2, %vm302_vm3 }
  0x13   :  { %v298_v57 = vsub.f32 1.0, %v297_v55 }
  0x14   :  { %339 = vmatpush.msrb.mxu2 %v318_v48 }
  0x15   :  { %v299_v62 = vmul.f32 %v444_v52, %v298_v57 }
  0x16   :  { %340 = vmatpush.msrb.mxu2 %v317_v49 }
  0x17   :  { %v300_v2 = vadd.f32 %v444_v52, %v299_v62 }
  0x18   :  { %341 = vmatpush.msrb.mxu2 %v316_v50 }
  0x19   :  { %v304_v10 = vsel %vm303_vm4, %v444_v52, %v300_v2 }
  0x1a   :  { %342 = vmatpush.msrb.mxu2 %v315_v51  ;;  %v309_v14 = vsel %vm306_vm5, %v308_v8, %v304_v10 }
  0x74   :  { %v40_v26 = vpop.permute.xlu0 %39 }
  0x86   :  { %v63_v27 = vpop.f32.mrf.mxu0 }
  0x87   :  { %v64_v30 = vadd.f32 %v63_v27, %v40_v26 }
  0x89   :  { %390 = vmatmul.msk.f32.vlgmr.msra.gmra.mxu3 %vm100_vm1, %v64_v30  ;;  %v99_v32 = vrot.slane %v64_v30, 1  ;;  %v193_v33 = vrot.slane %v64_v30, 4  ;;  %v241_v34 = vrot.slane %v64_v30, 6  ;;  %v145_v37 = vrot.slane %v64_v30, 2 }
  0x8a   :  { %234 = vmatpush.msra.mxu3 %v421_v28  ;;  %v169_v38 = vrot.slane %v64_v30, 3  ;;  %v217_v39 = vrot.slane %v64_v30, 5  ;;  %v265_v40 = vrot.slane %v64_v30, 7 }
  0x8b   :  { %389 = vmatmul.msk.f32.vlgmr.msra.gmra.mxu1 %vm100_vm1, %v99_v32  ;;  %393 = vmatmul.msk.f32.vlgmr.msra.gmra.mxu2 %vm100_vm1, %v193_v33  ;;  %v474_v33 = vmov 16.0  }
  0x8c   :  { %395 = vmatmul.msk.f32.vlgmr.msrb.gmra.mxu0 %vm100_vm1, %v241_v34  ;;  %235 = vmatpush.msra.mxu3 %v420_v31  ;;  %445 = vrcp.f32 %v474_v33 }
  0x8d   :  { %282 = vmatpush.msra.mxu1 %v429_v35 }
  0x8f   :  { %283 = vmatpush.msra.mxu1 %v428_v36 }
  0x91   :  { %391 = vmatmul.msk.f32.vlgmr.msrb.gmra.mxu3 %vm100_vm1, %v145_v37 }
  0x92   :  { %v446_v34 = vpop.eup %445 }
  0x93   :  { %392 = vmatmul.msk.f32.vlgmr.msrb.gmra.mxu1 %vm100_vm1, %v169_v38  ;;  %v363_v35 = vmul.f32 16.0, %v446_v34  ;;  %vm367_vm8 = vweird.f32 %v446_v34 }
  0x95   :  { %v364_v36 = vsub.f32 1.0, %v363_v35 }
  0x97   :  { %v365_v37 = vmul.f32 %v446_v34, %v364_v36 }
  0x99   :  { %394 = vmatmul.msk.f32.vlgmr.msra.gmra.mxu3 %vm100_vm1, %v217_v39  ;;  %v366_v38 = vadd.f32 %v446_v34, %v365_v37 }
  0x9b   :  { %396 = vmatmul.msk.f32.vlgmr.msra.gmra.mxu1 %vm100_vm1, %v265_v40  ;;  %v368_v39 = vsel %vm367_vm8, %v446_v34, %v366_v38 }
 0x108   :  { %v120_v53 = vpop.f32.mrf.mxu1 }
 0x109   :  { %v261_v7 = vpop.f32.mrf.mxu0 }
 0x10c   :  { %v142_v54 = vpop.f32.mrf.mxu3 }
 0x10d   :  { %v143_v56 = vadd.f32 %v142_v54, %v120_v53 }
 0x10e   :  { %v213_v63 = vpop.f32.mrf.mxu2 }
 0x110   :  { %v189_v60 = vpop.f32.mrf.mxu1 }
 0x114   :  { %v165_v58 = vpop.f32.mrf.mxu3 }
 0x115   :  { %v168_v59 = vadd.f32 %v165_v58, %v143_v56 }
 0x117   :  { %v192_v61 = vadd.f32 %v189_v60, %v168_v59 }
 0x118   :  { %v285_v12 = vpop.f32.mrf.mxu1 }
 0x119   :  { %v216_v1 = vadd.f32 %v213_v63, %v192_v61 }
 0x11c   :  { %v237_v4 = vpop.f32.mrf.mxu3 }
 0x11d   :  { %v240_v6 = vadd.f32 %v237_v4, %v216_v1 }
 0x11f   :  { %v264_v9 = vadd.f32 %v261_v7, %v240_v6 }
 0x121   :  { %v288_v13 = vadd.f32 %v285_v12, %v264_v9 }
 0x123   :  { %v311_v15 = vadd.f32 %v310_v11, %v288_v13 }
 0x125   :  { %v312_v17 = vmul.f32 %v311_v15, %v309_v14 }
 0x127   :  { %v313_v19 = vmul.f32 %v312_v17, %v292_v16 }
 0x129   :  { %v314_v20 = vadd.f32 %v313_v19, %v293_v18 }
 0x12b   :  { %397 = vmatmul.msk.f32.vlgmr.msrb.gmra.mxu2 %vm323_vm6, %v314_v20 }
 0x1ae   :  { %v344_v22 = vpop.f32.mrf.mxu2 }
 0x1af   :  { %v348_v23 = vsub.f32 %v344_v22, %v347_v21 }
 0x1b1   :  { %v349_v24 = vmul.f32 %v348_v23, %v348_v23 }
 0x1b3   :  { %v351_v25 = vsel %vm350_vm7, %v349_v24, 0.0 }
 0x1b4   :  { %352 = vadd.xlane.f32.xlu0 %v351_v25 }
 0x227   :  { %v353_v26 = vpop.xlane.xlu0 %352 }
 0x228   :  { %v354_v27 = vrot.slane %v353_v26, 4 }
 0x22a   :  { %v355_v28 = vadd.f32 %v354_v27, %v353_v26 }
 0x22c   :  { %v356_v29 = vrot.slane %v355_v28, 2 }
 0x22e   :  { %v357_v30 = vadd.f32 %v356_v29, %v355_v28 }
 0x230   :  { %v358_v31 = vrot.slane %v357_v30, 1 }
 0x232   :  { %v359_v32 = vadd.f32 %v358_v31, %v357_v30 }
 0x234   :  { %437 = vpush %v359_v32 }
 0x265   :  { %s438_s10 = spop %437 }
 0x266   :  { %v361_v40 = vstv %s438_s10 }
 0x267   :  { %v369_v41 = vmul.f32 %v368_v39, %v361_v40 }
 0x269   :  { %371 = vst.msk [vmem:[#allocation3] sm:$0x1] %vm370_vm9, %v369_v41 }
 0x26a   :  { %382 = dma.vmem_to_hbm [thread:$0]  %s378_s6, 16, %s380_s9, [#allocation4]  }
 0x26b   :  { %471 = dma.done.wait [#allocation4], 16  }
 0x26c   :  { %472 = vsyncadd [#allocation4], 4294967280 }
 0x26d   :  { %387 = vsyncpa [#allocation4], 1 }

</bundles_post_ra>
